<compile_context>
chip_gen: v7x
topology: tpu7x:2x2x1
jax: 0.10.0
libtpu: 0.0.40
codegen_flags: <defaults>
</compile_context>

<pallas_src>
import numpy as np
import jax
import jax.numpy as jnp
from jax.experimental import pallas as pl
from jax.experimental.pallas import tpu as pltpu


def _pick_lane_tile(hw, max_lanes=2048):
    """Largest multiple of 128 that divides hw and is <= max_lanes.

    Capped by the 64-entry vreg file (not VMEM): with ~5 live (C, L) f32
    arrays per step, L=2048 keeps live state at a comfortable vreg count.
    """
    best = 128
    l = 128
    while l <= min(max_lanes, hw):
        if hw % l == 0:
            best = l
        l += 128
    return best


def _ddpm_step_kernel(low_ref, snr_ref, w_ref, bgl_ref, step_ref,
                      noise0_ref, noise_ref, y_ref, base_ref):
    """One reverse-diffusion step for one (batch, lane-tile) cell.

    Grid axis 2 (innermost, "arbitrary") walks k = 0..T-1, i.e.
    time_step = T-1-k.  y_ref is the resident running state y_t.
    """
    k = pl.program_id(2)
    n_steps = pl.num_programs(2)

    w = w_ref[...]                     # (3C, C): rows [W_low; W_snr; W_yt]
    C = w.shape[1]

    # Per-step constants, already in grid order (row k <-> time_step T-1-k).
    sarr = step_ref[0]                 # (C, 128)
    dt = sarr[:, 0:1]                  # (C, 1)  delta * t/T
    c1 = sarr[0:1, 1:2]                # (1, 1)  sqrt(1/alpha_t)
    c2 = sarr[0:1, 2:3]                # (1, 1)  c1*(1-alpha_t)/sqrt(1-alpha_bar_t)
    sv = sarr[0:1, 3:4]                # (1, 1)  sqrt(var_t), 0 at t == 0

    # Once per (b, j) cell: y_T = N(0, I); hoist the y_t-independent part of
    # the synthetic eps model into VMEM scratch (reused for all T steps).
    @pl.when(k == 0)
    def _init():
        low = low_ref[0]               # (C, L)
        snr = snr_ref[0]               # (C, L)
        acc = jnp.broadcast_to(bgl_ref[0], low.shape)   # bias + gamma*light_high
        for ci in range(C):            # dense outer-product FMAs (VPU)
            acc = acc + w[0:C, ci:ci + 1] * low[ci:ci + 1, :]
            acc = acc + w[C:2 * C, ci:ci + 1] * snr[ci:ci + 1, :]
        base_ref[...] = acc
        y_ref[0] = noise0_ref[0]       # y_T ~ N(0, I)

    # eps = model(cat([lowlight, snr_map, y_t], 1), t, light_high)
    y = y_ref[0]                       # (C, L) running y_t (f32)
    eps = base_ref[...] + dt
    for ci in range(C):
        eps = eps + w[2 * C:3 * C, ci:ci + 1] * y[ci:ci + 1, :]

    # xt_prev_mean = coeff1*y_t - coeff2*eps ;  y_{t-1} = mean + sqrt(var)*noise
    y_new = c1 * y - c2 * eps + sv * noise_ref[0, 0]
    y_ref[0] = y_new

    @pl.when(k == n_steps - 1)         # time_step == 0: y_0 = clip(mean, -1, 1)
    def _final():
        y_ref[0] = jnp.clip(y_new, -1.0, 1.0)


class GaussianDiffusionSampler:
    """JAX/Pallas re-implementation of the DDPM sampler forward pass."""

    def __init__(self, beta_1, beta_T, T, channels=4):
        self.T = int(T)
        self.C = int(channels)
        C = self.C

        # Schedule buffers computed in float64 (PyTorch registers .double() buffers).
        betas = np.linspace(beta_1, beta_T, T, dtype=np.float64)
        alphas = 1.0 - betas
        alphas_bar = np.cumprod(alphas)
        alphas_bar_prev = np.concatenate([[1.0], alphas_bar[:-1]])
        coeff1 = np.sqrt(1.0 / alphas)
        coeff2 = coeff1 * (1.0 - alphas) / np.sqrt(1.0 - alphas_bar)
        posterior_var = betas * (1.0 - alphas_bar_prev) / (1.0 - alphas_bar)
        var = np.concatenate([posterior_var[1:2], betas[1:]])
        sqrt_var = np.sqrt(var)
        sqrt_var[0] = 0.0   # time_step == 0: the PyTorch loop sets noise = 0

        # Deterministic synthetic noise-prediction "model":
        #   eps = W_low@low + W_snr@snr + W_yt@y_t + bias + gamma*light + delta*(t/T)
        # i.e. a 1x1 conv over cat([lowlight, snr_map, y_t], dim=1).
        # TODO(synk): the real UNet `model` from the PyTorch __init__ has no Pallas source.
        kw1, kw2, kw3, kb, kg, kd = jax.random.split(jax.random.PRNGKey(42), 6)
        w_low = jax.random.normal(kw1, (C, C), jnp.float32) * 0.1
        w_snr = jax.random.normal(kw2, (C, C), jnp.float32) * 0.1
        w_yt = jax.random.normal(kw3, (C, C), jnp.float32) * 0.1
        self.bias = jax.random.normal(kb, (C, 1), jnp.float32) * 0.01
        self.gamma = jax.random.normal(kg, (C, 1), jnp.float32) * 0.01
        delta = jax.random.normal(kd, (C, 1), jnp.float32) * 0.01
        self.w_all = jnp.concatenate([w_low, w_snr, w_yt], axis=0)   # (3C, C)

        # Per-step constants packed in GRID order (row k <-> time_step T-1-k):
        # lane 0 = delta*t/T (per channel), lane 1 = coeff1, 2 = coeff2, 3 = sqrt(var).
        rev_ts = np.arange(T - 1, -1, -1)
        delta_np = np.asarray(delta, np.float64)
        steps = np.zeros((T, C, 128), np.float32)
        steps[:, :, 0] = delta_np[:, 0][None, :] * (rev_ts[:, None].astype(np.float64) / T)
        steps[:, :, 1] = coeff1[rev_ts][:, None]
        steps[:, :, 2] = coeff2[rev_ts][:, None]
        steps[:, :, 3] = sqrt_var[rev_ts][:, None]
        self.step_consts = jnp.asarray(steps)

    def forward(self, lowlight_image, snr_map, gt_img=None, light_high=None,
                ddim=False, unconditional_guidance_scale=1, ddim_step=None,
                rng_key=None):
        if ddim:
            # TODO(synk): DDIM branch (1000-step schedule, CFG via context_zero
            # model calls) not implemented.
            raise NotImplementedError("ddim=True path is not implemented")
        if rng_key is None:
            rng_key = jax.random.PRNGKey(0)

        B, C, H, W = lowlight_image.shape
        HW = H * W
        HWp = ((HW + 127) // 128) * 128        # pad lanes to a multiple of 128

        # light_high = gt_image.mean([1,2,3]) — one XLA reduce in the wrapper.
        if light_high is None:
            light_high = jnp.mean(jnp.asarray(gt_img, jnp.float32), axis=(1, 2, 3))
        light_high = jnp.asarray(light_high, jnp.float32).reshape(B, 1, 1)
        # bias + gamma*light_high folded into one per-batch (B, C, 1) input.
        bgl = self.bias[None, :, :] + self.gamma[None, :, :] * light_high

        def _prep(x):
            x = jnp.asarray(x, jnp.float32).reshape(B, C, HW)
            if HWp != HW:
                x = jnp.pad(x, ((0, 0), (0, 0), (0, HWp - HW)))
            return x

        low_r = _prep(lowlight_image)
        snr_r = _prep(snr_map)

        # Pre-generated Gaussian noise (replaces torch.randn_like); the slab at
        # the final step is multiplied by sqrt(var)=0, matching noise=0 there.
        k0, k1 = jax.random.split(rng_key)
        noise0 = jax.random.normal(k0, (B, C, HWp), jnp.float32)       # y_T
        noise_steps = jax.random.normal(k1, (self.T, B, C, HWp), jnp.float32)

        L = _pick_lane_tile(HWp)
        nj = HWp // L
        img_spec = pl.BlockSpec((1, C, L), lambda b, j, k: (b, 0, j))

        y0 = pl.pallas_call(
            _ddpm_step_kernel,
            out_shape=jax.ShapeDtypeStruct((B, C, HWp), jnp.float32),
            grid=(B, nj, self.T),
            in_specs=[
                img_spec,                                               # lowlight
                img_spec,                                               # snr_map
                pl.BlockSpec((3 * C, C), lambda b, j, k: (0, 0)),       # [W_low;W_snr;W_yt]
                pl.BlockSpec((1, C, 1), lambda b, j, k: (b, 0, 0)),     # bias+gamma*light
                pl.BlockSpec((1, C, 128), lambda b, j, k: (k, 0, 0)),   # per-step scalars
                img_spec,                                               # y_T init noise
                pl.BlockSpec((1, 1, C, L), lambda b, j, k: (k, b, 0, j)),  # per-step noise
            ],
            out_specs=img_spec,
            scratch_shapes=[pltpu.VMEM((C, L), jnp.float32)],           # hoisted base
            compiler_params=pltpu.CompilerParams(
                dimension_semantics=("parallel", "parallel", "arbitrary")),
        )(low_r, snr_r, self.w_all, bgl, self.step_consts, noise0, noise_steps)

        return y0[:, :, :HW].reshape(B, C, H, W)


if __name__ == "__main__":
    B, C, H, W = 2, 4, 16, 16
    T = 100
    sampler = GaussianDiffusionSampler(beta_1=1e-4, beta_T=0.02, T=T, channels=C)

    key = jax.random.PRNGKey(0)
    k_low, k_snr, k_gt, k_noise = jax.random.split(key, 4)
    lowlight_image = jax.random.uniform(k_low, (B, C, H, W), jnp.float32)
    snr_map = jax.random.uniform(k_snr, (B, C, H, W), jnp.float32)
    gt_img = jax.random.uniform(k_gt, (B, C, H, W), jnp.float32)

    y_0 = sampler.forward(lowlight_image, snr_map, gt_img=gt_img, rng_key=k_noise)
    y_0 = jax.block_until_ready(y_0)

    assert y_0.shape == (B, C, H, W)
    assert bool(jnp.all(jnp.isfinite(y_0)))
    assert float(jnp.max(jnp.abs(y_0))) <= 1.0 + 1e-6
    print("KERNEL_OK")
</pallas_src>

<mosaic_0001>
module attributes {stable_mosaic.version = 11 : i64} {
  func.func @_ddpm_step_kernel(%arg0: i32, %arg1: i32, %arg2: i32, %arg3: memref<1x4x256xf32, #tpu.memory_space<vmem>>, %arg4: memref<1x4x256xf32, #tpu.memory_space<vmem>>, %arg5: memref<12x4xf32, #tpu.memory_space<vmem>>, %arg6: memref<1x4x1xf32, #tpu.memory_space<vmem>>, %arg7: memref<1x4x128xf32, #tpu.memory_space<vmem>>, %arg8: memref<1x4x256xf32, #tpu.memory_space<vmem>>, %arg9: memref<1x1x4x256xf32, #tpu.memory_space<vmem>>, %arg10: memref<1x4x256xf32, #tpu.memory_space<vmem>>, %arg11: memref<4x256xf32, #tpu.memory_space<vmem>>) attributes {dimension_semantics = [#tpu.dimension_semantics<parallel>, #tpu.dimension_semantics<parallel>, #tpu.dimension_semantics<arbitrary>], iteration_bounds = array<i64: 2, 1, 100>, scalar_prefetch = 0 : i64, scratch_operands = 1 : i64, tpu.core_type = #tpu.core_type<tc>, window_params = [{transform_indices = @transform_0, window_bounds = array<i64: 1, 4, 256>}, {transform_indices = @transform_1, window_bounds = array<i64: 1, 4, 256>}, {pipeline_mode = #tpu.pipeline_mode<synchronous>, transform_indices = @transform_2, window_bounds = array<i64: 12, 4>}, {transform_indices = @transform_3, window_bounds = array<i64: 1, 4, 1>}, {transform_indices = @transform_4, window_bounds = array<i64: 1, 4, 128>}, {transform_indices = @transform_5, window_bounds = array<i64: 1, 4, 256>}, {transform_indices = @transform_6, window_bounds = array<i64: 1, 1, 4, 256>}, {transform_indices = @transform_7, window_bounds = array<i64: 1, 4, 256>}]} {
    %c0 = arith.constant 0 : index
    %c0_0 = arith.constant 0 : index
    %0 = vector.load %arg5[%c0, %c0_0] : memref<12x4xf32, #tpu.memory_space<vmem>>, vector<12x4xf32>
    %c0_1 = arith.constant 0 : index
    %c0_2 = arith.constant 0 : index
    %c0_3 = arith.constant 0 : index
    %1 = vector.load %arg7[%c0_1, %c0_2, %c0_3] : memref<1x4x128xf32, #tpu.memory_space<vmem>>, vector<1x4x128xf32>
    %2 = vector.shape_cast %1 : vector<1x4x128xf32> to vector<4x128xf32>
    %3 = vector.extract_strided_slice %2 {offsets = [0, 0], sizes = [4, 1], strides = [1, 1]} : vector<4x128xf32> to vector<4x1xf32>
    %4 = vector.extract_strided_slice %2 {offsets = [0, 1], sizes = [1, 1], strides = [1, 1]} : vector<4x128xf32> to vector<1x1xf32>
    %5 = vector.extract_strided_slice %2 {offsets = [0, 2], sizes = [1, 1], strides = [1, 1]} : vector<4x128xf32> to vector<1x1xf32>
    %6 = vector.extract_strided_slice %2 {offsets = [0, 3], sizes = [1, 1], strides = [1, 1]} : vector<4x128xf32> to vector<1x1xf32>
    %c0_i32 = arith.constant 0 : i32
    %7 = arith.cmpi eq, %arg2, %c0_i32 : i32
    %8 = arith.extui %7 : i1 to i32
    %c0_i32_4 = arith.constant 0 : i32
    %9 = arith.cmpi ne, %8, %c0_i32_4 : i32
    scf.if %9 {
      %c0_18 = arith.constant 0 : index
      %c0_19 = arith.constant 0 : index
      %c0_20 = arith.constant 0 : index
      %55 = vector.load %arg3[%c0_18, %c0_19, %c0_20] : memref<1x4x256xf32, #tpu.memory_space<vmem>>, vector<1x4x256xf32>
      %56 = vector.shape_cast %55 : vector<1x4x256xf32> to vector<4x256xf32>
      %c0_21 = arith.constant 0 : index
      %c0_22 = arith.constant 0 : index
      %c0_23 = arith.constant 0 : index
      %57 = vector.load %arg4[%c0_21, %c0_22, %c0_23] : memref<1x4x256xf32, #tpu.memory_space<vmem>>, vector<1x4x256xf32>
      %58 = vector.shape_cast %57 : vector<1x4x256xf32> to vector<4x256xf32>
      %c0_24 = arith.constant 0 : index
      %c0_25 = arith.constant 0 : index
      %c0_26 = arith.constant 0 : index
      %59 = vector.load %arg6[%c0_24, %c0_25, %c0_26] : memref<1x4x1xf32, #tpu.memory_space<vmem>>, vector<1x4x1xf32>
      %60 = vector.shape_cast %59 : vector<1x4x1xf32> to vector<4x1xf32>
      %61 = vector.shape_cast %60 : vector<4x1xf32> to vector<4x1xf32>
      %62 = vector.broadcast %61 : vector<4x1xf32> to vector<4x256xf32>
      %63 = vector.extract_strided_slice %0 {offsets = [0, 0], sizes = [4, 1], strides = [1, 1]} : vector<12x4xf32> to vector<4x1xf32>
      %64 = vector.extract_strided_slice %56 {offsets = [0, 0], sizes = [1, 256], strides = [1, 1]} : vector<4x256xf32> to vector<1x256xf32>
      %65 = vector.broadcast %63 : vector<4x1xf32> to vector<4x256xf32>
      %66 = vector.broadcast %64 : vector<1x256xf32> to vector<4x256xf32>
      %67 = arith.mulf %65, %66 : vector<4x256xf32>
      %68 = arith.addf %62, %67 : vector<4x256xf32>
      %69 = vector.extract_strided_slice %0 {offsets = [4, 0], sizes = [4, 1], strides = [1, 1]} : vector<12x4xf32> to vector<4x1xf32>
      %70 = vector.extract_strided_slice %58 {offsets = [0, 0], sizes = [1, 256], strides = [1, 1]} : vector<4x256xf32> to vector<1x256xf32>
      %71 = vector.broadcast %69 : vector<4x1xf32> to vector<4x256xf32>
      %72 = vector.broadcast %70 : vector<1x256xf32> to vector<4x256xf32>
      %73 = arith.mulf %71, %72 : vector<4x256xf32>
      %74 = arith.addf %68, %73 : vector<4x256xf32>
      %75 = vector.extract_strided_slice %0 {offsets = [0, 1], sizes = [4, 1], strides = [1, 1]} : vector<12x4xf32> to vector<4x1xf32>
      %76 = vector.extract_strided_slice %56 {offsets = [1, 0], sizes = [1, 256], strides = [1, 1]} : vector<4x256xf32> to vector<1x256xf32>
      %77 = vector.broadcast %75 : vector<4x1xf32> to vector<4x256xf32>
      %78 = vector.broadcast %76 : vector<1x256xf32> to vector<4x256xf32>
      %79 = arith.mulf %77, %78 : vector<4x256xf32>
      %80 = arith.addf %74, %79 : vector<4x256xf32>
      %81 = vector.extract_strided_slice %0 {offsets = [4, 1], sizes = [4, 1], strides = [1, 1]} : vector<12x4xf32> to vector<4x1xf32>
      %82 = vector.extract_strided_slice %58 {offsets = [1, 0], sizes = [1, 256], strides = [1, 1]} : vector<4x256xf32> to vector<1x256xf32>
      %83 = vector.broadcast %81 : vector<4x1xf32> to vector<4x256xf32>
      %84 = vector.broadcast %82 : vector<1x256xf32> to vector<4x256xf32>
      %85 = arith.mulf %83, %84 : vector<4x256xf32>
      %86 = arith.addf %80, %85 : vector<4x256xf32>
      %87 = vector.extract_strided_slice %0 {offsets = [0, 2], sizes = [4, 1], strides = [1, 1]} : vector<12x4xf32> to vector<4x1xf32>
      %88 = vector.extract_strided_slice %56 {offsets = [2, 0], sizes = [1, 256], strides = [1, 1]} : vector<4x256xf32> to vector<1x256xf32>
      %89 = vector.broadcast %87 : vector<4x1xf32> to vector<4x256xf32>
      %90 = vector.broadcast %88 : vector<1x256xf32> to vector<4x256xf32>
      %91 = arith.mulf %89, %90 : vector<4x256xf32>
      %92 = arith.addf %86, %91 : vector<4x256xf32>
      %93 = vector.extract_strided_slice %0 {offsets = [4, 2], sizes = [4, 1], strides = [1, 1]} : vector<12x4xf32> to vector<4x1xf32>
      %94 = vector.extract_strided_slice %58 {offsets = [2, 0], sizes = [1, 256], strides = [1, 1]} : vector<4x256xf32> to vector<1x256xf32>
      %95 = vector.broadcast %93 : vector<4x1xf32> to vector<4x256xf32>
      %96 = vector.broadcast %94 : vector<1x256xf32> to vector<4x256xf32>
      %97 = arith.mulf %95, %96 : vector<4x256xf32>
      %98 = arith.addf %92, %97 : vector<4x256xf32>
      %99 = vector.extract_strided_slice %0 {offsets = [0, 3], sizes = [4, 1], strides = [1, 1]} : vector<12x4xf32> to vector<4x1xf32>
      %100 = vector.extract_strided_slice %56 {offsets = [3, 0], sizes = [1, 256], strides = [1, 1]} : vector<4x256xf32> to vector<1x256xf32>
      %101 = vector.broadcast %99 : vector<4x1xf32> to vector<4x256xf32>
      %102 = vector.broadcast %100 : vector<1x256xf32> to vector<4x256xf32>
      %103 = arith.mulf %101, %102 : vector<4x256xf32>
      %104 = arith.addf %98, %103 : vector<4x256xf32>
      %105 = vector.extract_strided_slice %0 {offsets = [4, 3], sizes = [4, 1], strides = [1, 1]} : vector<12x4xf32> to vector<4x1xf32>
      %106 = vector.extract_strided_slice %58 {offsets = [3, 0], sizes = [1, 256], strides = [1, 1]} : vector<4x256xf32> to vector<1x256xf32>
      %107 = vector.broadcast %105 : vector<4x1xf32> to vector<4x256xf32>
      %108 = vector.broadcast %106 : vector<1x256xf32> to vector<4x256xf32>
      %109 = arith.mulf %107, %108 : vector<4x256xf32>
      %110 = arith.addf %104, %109 : vector<4x256xf32>
      %c0_27 = arith.constant 0 : index
      %c0_28 = arith.constant 0 : index
      %111 = vector.load %arg11[%c0_27, %c0_28] : memref<4x256xf32, #tpu.memory_space<vmem>>, vector<4x256xf32>
      tpu.vector_store %arg11[%c0_27, %c0_28], %110 {strides = array<i32>} : memref<4x256xf32, #tpu.memory_space<vmem>>, vector<4x256xf32>,
      %c0_29 = arith.constant 0 : index
      %c0_30 = arith.constant 0 : index
      %c0_31 = arith.constant 0 : index
      %112 = vector.load %arg8[%c0_29, %c0_30, %c0_31] : memref<1x4x256xf32, #tpu.memory_space<vmem>>, vector<1x4x256xf32>
      %113 = vector.shape_cast %112 : vector<1x4x256xf32> to vector<4x256xf32>
      %c0_32 = arith.constant 0 : index
      %c0_33 = arith.constant 0 : index
      %c0_34 = arith.constant 0 : index
      %114 = vector.load %arg10[%c0_32, %c0_33, %c0_34] : memref<1x4x256xf32, #tpu.memory_space<vmem>>, vector<1x4x256xf32>
      %115 = vector.shape_cast %114 : vector<1x4x256xf32> to vector<4x256xf32>
      %116 = vector.shape_cast %113 : vector<4x256xf32> to vector<1x4x256xf32>
      tpu.vector_store %arg10[%c0_32, %c0_33, %c0_34], %116 {strides = array<i32>} : memref<1x4x256xf32, #tpu.memory_space<vmem>>, vector<1x4x256xf32>,
    } else {
    }
    %c0_5 = arith.constant 0 : index
    %c0_6 = arith.constant 0 : index
    %c0_7 = arith.constant 0 : index
    %10 = vector.load %arg10[%c0_5, %c0_6, %c0_7] : memref<1x4x256xf32, #tpu.memory_space<vmem>>, vector<1x4x256xf32>
    %11 = vector.shape_cast %10 : vector<1x4x256xf32> to vector<4x256xf32>
    %c0_8 = arith.constant 0 : index
    %c0_9 = arith.constant 0 : index
    %12 = vector.load %arg11[%c0_8, %c0_9] : memref<4x256xf32, #tpu.memory_space<vmem>>, vector<4x256xf32>
    %13 = vector.broadcast %3 : vector<4x1xf32> to vector<4x256xf32>
    %14 = arith.addf %12, %13 : vector<4x256xf32>
    %15 = vector.extract_strided_slice %0 {offsets = [8, 0], sizes = [4, 1], strides = [1, 1]} : vector<12x4xf32> to vector<4x1xf32>
    %16 = vector.extract_strided_slice %11 {offsets = [0, 0], sizes = [1, 256], strides = [1, 1]} : vector<4x256xf32> to vector<1x256xf32>
    %17 = vector.broadcast %15 : vector<4x1xf32> to vector<4x256xf32>
    %18 = vector.broadcast %16 : vector<1x256xf32> to vector<4x256xf32>
    %19 = arith.mulf %17, %18 : vector<4x256xf32>
    %20 = arith.addf %14, %19 : vector<4x256xf32>
    %21 = vector.extract_strided_slice %0 {offsets = [8, 1], sizes = [4, 1], strides = [1, 1]} : vector<12x4xf32> to vector<4x1xf32>
    %22 = vector.extract_strided_slice %11 {offsets = [1, 0], sizes = [1, 256], strides = [1, 1]} : vector<4x256xf32> to vector<1x256xf32>
    %23 = vector.broadcast %21 : vector<4x1xf32> to vector<4x256xf32>
    %24 = vector.broadcast %22 : vector<1x256xf32> to vector<4x256xf32>
    %25 = arith.mulf %23, %24 : vector<4x256xf32>
    %26 = arith.addf %20, %25 : vector<4x256xf32>
    %27 = vector.extract_strided_slice %0 {offsets = [8, 2], sizes = [4, 1], strides = [1, 1]} : vector<12x4xf32> to vector<4x1xf32>
    %28 = vector.extract_strided_slice %11 {offsets = [2, 0], sizes = [1, 256], strides = [1, 1]} : vector<4x256xf32> to vector<1x256xf32>
    %29 = vector.broadcast %27 : vector<4x1xf32> to vector<4x256xf32>
    %30 = vector.broadcast %28 : vector<1x256xf32> to vector<4x256xf32>
    %31 = arith.mulf %29, %30 : vector<4x256xf32>
    %32 = arith.addf %26, %31 : vector<4x256xf32>
    %33 = vector.extract_strided_slice %0 {offsets = [8, 3], sizes = [4, 1], strides = [1, 1]} : vector<12x4xf32> to vector<4x1xf32>
    %34 = vector.extract_strided_slice %11 {offsets = [3, 0], sizes = [1, 256], strides = [1, 1]} : vector<4x256xf32> to vector<1x256xf32>
    %35 = vector.broadcast %33 : vector<4x1xf32> to vector<4x256xf32>
    %36 = vector.broadcast %34 : vector<1x256xf32> to vector<4x256xf32>
    %37 = arith.mulf %35, %36 : vector<4x256xf32>
    %38 = arith.addf %32, %37 : vector<4x256xf32>
    %39 = vector.broadcast %4 : vector<1x1xf32> to vector<4x256xf32>
    %40 = arith.mulf %39, %11 : vector<4x256xf32>
    %41 = vector.broadcast %5 : vector<1x1xf32> to vector<4x256xf32>
    %42 = arith.mulf %41, %38 : vector<4x256xf32>
    %43 = arith.subf %40, %42 : vector<4x256xf32>
    %c0_10 = arith.constant 0 : index
    %c0_11 = arith.constant 0 : index
    %c0_12 = arith.constant 0 : index
    %c0_13 = arith.constant 0 : index
    %44 = vector.load %arg9[%c0_10, %c0_11, %c0_12, %c0_13] : memref<1x1x4x256xf32, #tpu.memory_space<vmem>>, vector<1x1x4x256xf32>
    %45 = vector.shape_cast %44 : vector<1x1x4x256xf32> to vector<4x256xf32>
    %46 = vector.broadcast %6 : vector<1x1xf32> to vector<4x256xf32>
    %47 = arith.mulf %46, %45 : vector<4x256xf32>
    %48 = arith.addf %43, %47 : vector<4x256xf32>
    %c0_14 = arith.constant 0 : index
    %c0_15 = arith.constant 0 : index
    %c0_16 = arith.constant 0 : index
    %49 = vector.load %arg10[%c0_14, %c0_15, %c0_16] : memref<1x4x256xf32, #tpu.memory_space<vmem>>, vector<1x4x256xf32>
    %50 = vector.shape_cast %49 : vector<1x4x256xf32> to vector<4x256xf32>
    %51 = vector.shape_cast %48 : vector<4x256xf32> to vector<1x4x256xf32>
    tpu.vector_store %arg10[%c0_14, %c0_15, %c0_16], %51 {strides = array<i32>} : memref<1x4x256xf32, #tpu.memory_space<vmem>>, vector<1x4x256xf32>,
    %c99_i32 = arith.constant 99 : i32
    %52 = arith.cmpi eq, %arg2, %c99_i32 : i32
    %53 = arith.extui %52 : i1 to i32
    %c0_i32_17 = arith.constant 0 : i32
    %54 = arith.cmpi ne, %53, %c0_i32_17 : i32
    scf.if %54 {
      %cst = arith.constant -1.000000e+00 : f32
      %cst_18 = arith.constant 1.000000e+00 : f32
      %55 = vector.broadcast %cst : f32 to vector<4x256xf32>
      %56 = arith.maximumf %55, %48 : vector<4x256xf32>
      %57 = vector.broadcast %cst_18 : f32 to vector<4x256xf32>
      %58 = arith.minimumf %57, %56 : vector<4x256xf32>
      %c0_19 = arith.constant 0 : index
      %c0_20 = arith.constant 0 : index
      %c0_21 = arith.constant 0 : index
      %59 = vector.load %arg10[%c0_19, %c0_20, %c0_21] : memref<1x4x256xf32, #tpu.memory_space<vmem>>, vector<1x4x256xf32>
      %60 = vector.shape_cast %59 : vector<1x4x256xf32> to vector<4x256xf32>
      %61 = vector.shape_cast %58 : vector<4x256xf32> to vector<1x4x256xf32>
      tpu.vector_store %arg10[%c0_19, %c0_20, %c0_21], %61 {strides = array<i32>} : memref<1x4x256xf32, #tpu.memory_space<vmem>>, vector<1x4x256xf32>,
    } else {
    }
    return
  }
  func.func @transform_0(%arg0: i32, %arg1: i32, %arg2: i32) -> (i32, i32, i32) {
    %c0_i32 = arith.constant 0 : i32
    %c0_i32_0 = arith.constant 0 : i32
    return %arg0, %c0_i32, %arg1 : i32, i32, i32
  }
  func.func @transform_1(%arg0: i32, %arg1: i32, %arg2: i32) -> (i32, i32, i32) {
    %c0_i32 = arith.constant 0 : i32
    %c0_i32_0 = arith.constant 0 : i32
    return %arg0, %c0_i32, %arg1 : i32, i32, i32
  }
  func.func @transform_2(%arg0: i32, %arg1: i32, %arg2: i32) -> (i32, i32) {
    %c0_i32 = arith.constant 0 : i32
    %c0_i32_0 = arith.constant 0 : i32
    %c0_i32_1 = arith.constant 0 : i32
    return %c0_i32, %c0_i32_0 : i32, i32
  }
  func.func @transform_3(%arg0: i32, %arg1: i32, %arg2: i32) -> (i32, i32, i32) {
    %c0_i32 = arith.constant 0 : i32
    %c0_i32_0 = arith.constant 0 : i32
    %c0_i32_1 = arith.constant 0 : i32
    return %arg0, %c0_i32, %c0_i32_0 : i32, i32, i32
  }
  func.func @transform_4(%arg0: i32, %arg1: i32, %arg2: i32) -> (i32, i32, i32) {
    %c0_i32 = arith.constant 0 : i32
    %c0_i32_0 = arith.constant 0 : i32
    %c0_i32_1 = arith.constant 0 : i32
    return %arg2, %c0_i32, %c0_i32_0 : i32, i32, i32
  }
  func.func @transform_5(%arg0: i32, %arg1: i32, %arg2: i32) -> (i32, i32, i32) {
    %c0_i32 = arith.constant 0 : i32
    %c0_i32_0 = arith.constant 0 : i32
    return %arg0, %c0_i32, %arg1 : i32, i32, i32
  }
  func.func @transform_6(%arg0: i32, %arg1: i32, %arg2: i32) -> (i32, i32, i32, i32) {
    %c0_i32 = arith.constant 0 : i32
    %c0_i32_0 = arith.constant 0 : i32
    return %arg2, %arg0, %c0_i32, %arg1 : i32, i32, i32, i32
  }
  func.func @transform_7(%arg0: i32, %arg1: i32, %arg2: i32) -> (i32, i32, i32) {
    %c0_i32 = arith.constant 0 : i32
    %c0_i32_0 = arith.constant 0 : i32
    return %arg0, %c0_i32, %arg1 : i32, i32, i32
  }
}

</mosaic_0001>

<bundles_post_ra>
// kernel: tpu_custom_call.1
= control target key start
LH: loop header
LB: loop body
LE: loop exit
PB: predicated region body
PF: predicated region fallthrough
CT: control target
= control target key end

     0   :  { %s1950_s0 = inlined_call_operand.vmem [shape: f32[2,4,256], index: 0, kind: input, shape index: {}]   ;;  %s1951_s1 = inlined_call_operand.vmem [shape: f32[2,4,256], index: 1, kind: input, shape index: {}]   ;;  %s1952_s2 = inlined_call_operand.vmem [shape: f32[12,4], index: 2, kind: input, shape index: {}]   ;;  %s1953_s3 = inlined_call_operand.vmem [shape: f32[2,4,1], index: 3, kind: input, shape index: {}]   ;;  %s1954_s4 = inlined_call_operand.hbm [shape: f32[100,4,128], index: 4, kind: input, shape index: {}]   ;;  %s1955_s5 = inlined_call_operand.vmem [shape: f32[2,4,256], index: 5, kind: input, shape index: {}]   ;;  %s1956_s6 = inlined_call_operand.hbm [shape: f32[100,2,4,256], index: 6, kind: input, shape index: {}]   ;;  %s1957_s7 = inlined_call_operand.hbm [shape: f32[2,4,256], index: 7, kind: output, shape index: {}]  }
   0x1   :  { %1974 = sst [smem:[#allocation22_spill]] %s1951_s1 }
   0x2   :  { %1975 = sst [smem:[#allocation23_spill]] %s1952_s2 }
   0x3   :  { %1976 = sst [smem:[#allocation24_spill]] %s1953_s3 }
   0x4   :  { %1977 = sst [smem:[#allocation25_spill]] %s1954_s4 }
   0x5   :  { %1978 = sst [smem:[#allocation26_spill]] %s1955_s5 }
   0x6   :  { %1979 = sst [smem:[#allocation27_spill]] %s1956_s6 }
   0x7   :  { %1980 = sst [smem:[#allocation28_spill]] %s1957_s7 }
   0x8   :  { %12 = vsyncpa [#allocation4], 0 }
   0x9   :  { %14 = vsyncpa [#allocation4 + $0x1], 0 }
   0xa   :  { %15 = vsyncpa [#allocation7], 0 }
   0xb   :  { %17 = vsyncpa [#allocation7 + $0x1], 0 }
   0xc   :  { %18 = vsyncpa [#allocation5], 0 }
   0xd   :  { %20 = vsyncpa [#allocation5 + $0x1], 0  ;;  %s1547_s24 = smov 0   ;;  %s1549_s25 = smov 0  }
   0xe   :  { %s1551_s26 = smov 0   ;;  %s1553_s27 = smov 0  }
   0xf   :  { %s1555_s28 = smov 0   ;;  %s1557_s29 = smov 0  }
  0x10   :  { %s1559_s30 = smov 0   ;;  %s1561_s8 = smov 0  }
  0x11   :  { %s1563_s9 = smov 0   ;;  %s1565_s10 = smov 0  }
  0x12   :  { %s1567_s11 = smov 0   ;;  %s1569_s12 = smov 0  }
  0x13   :  { %s1571_s13 = smov 0   ;;  %s1573_s14 = smov 0  }
  0x14 LB: > { %1981 = sst [smem:[#allocation12_spill]] %s1438_s24  ;;  %s1089_s15 = sadd.s32 4294967295, %s1490_s14   ;;  %s1490_s14 = sphi %s1573_s14, %s26_s14   ;;  %s1486_s13 = sphi %s1571_s13, %s2035_s13   ;;  %s1482_s12 = sphi %s1569_s12, %s2034_s12   ;;  %s1478_s11 = sphi %s1567_s11, %s2033_s11   ;;  %s1474_s10 = sphi %s1565_s10, %s2032_s10   ;;  %s1470_s9 = sphi %s1563_s9, %s2031_s9   ;;  %s1466_s8 = sphi %s1561_s8, %s2030_s8   ;;  %s1462_s30 = sphi %s1559_s30, %s2029_s30   ;;  %s1458_s29 = sphi %s1557_s29, %s2041_s29   ;;  %s1454_s28 = sphi %s1555_s28, %s2040_s28   ;;  %s1450_s27 = sphi %s1553_s27, %s2039_s27   ;;  %s1446_s26 = sphi %s1551_s26, %s2038_s26   ;;  %s1442_s25 = sphi %s1549_s25, %s2037_s25   ;;  %s1438_s24 = sphi %s1547_s24, %s2036_s24  }
  0x15   : > { %1982 = sst [smem:[#allocation13_spill]] %s1466_s8  ;;  %s38_s16 = sadd.s32 1, %s1482_s12 }
  0x16   : > { %1983 = sst [smem:[#allocation14_spill]] %s1470_s9  ;;  %p1617_p0 = scmp.ge.s32.totalorder %s38_s16, 100 }
  0x17   : > { %1984 = sst [smem:[#allocation15_spill]] %s1474_s10  ;;  %s155_s18 = sadd.s32 1, %s1470_s9 }
  0x18   : > { %1985 = sst [smem:[#allocation16_spill]] %s1482_s12  ;;  %p162_p1 = scmp.ne.s32.totalorder %s1470_s9, %s1466_s8 }
  0x19   : > { %1986 = sst [smem:[#allocation17_spill]] %s1486_s13  ;;  %p1962_p2 = scmp.eq.s32.totalorder %s1490_s14, 0 }
  0x1a   : > { %s2043_s16 = smov (%p1617_p0, %s38_s16), 0  ;;  %p168_p4 = scmp.ne.s32.totalorder %s1466_s8, %s1462_s30 }
  0x1b   : > { %1988 = sst [smem:[#allocation18_spill]] %s2043_s16  ;;  %p1631_p3 = por %p1962_p2, %p162_p1 }
  0x1c   : > { %s1638_s20 = ssub.s32 %s1482_s12, %s2043_s16  ;;  %p1640_p5 = scmp.eq.s32.totalorder %s1089_s15, 0 }
  0x1d   : > { %p153_p6 = scmp.eq.s32.totalorder %s1638_s20, 0  ;;  %p1645_p7 = scmp.eq.s32.totalorder %s1089_s15, 199 }
  0x1e   : > { %s1990_s21 = scalar_select %p1640_p5, 1, 0 }
  0x1f   : > { %s1991_s22 = scalar_select %p1645_p7, 1, 0 }
  0x20   : > { %p1651_p8 = por %p1640_p5, %p168_p4  ;;  %p1961_p9 = scmp.lt.s32.totalorder %s1490_s14, 200 }
  0x21   : > { %s1656_s30 = scalar_select %p153_p6, %s1470_s9, %s155_s18  }
  0x22   : > { %s1992_s23 = scalar_select %p1651_p8, 1, 0 }
  0x23   : > { %1993 = sst [smem:[#allocation19_spill]] %s1656_s30  ;;  %s314_s16 = sand.u32 1, %s1470_s9  }
  0x24   : > { %s1093_s7 = sshll.u32 %s314_s16, 2  ;;  %s1094_s10 = sshll.u32 %s1482_s12, 6 }
  0x25   : > { %s1994_s4 = sld [smem:[#allocation25_spill]]  ;;  %s318_s15 = scalar_lea.vmem [#allocation3], %s1093_s7 }
  0x26   : > { %s325_s1 = sshll.u32 %s318_s15, 4  ;;  %p1672_p10 = pnand %p1961_p9, %p1631_p3  ;;  %s1666_s1 = int_to_ptr.vmem [resolvable:$true] %s325_s1 }
  0x27   : > { %s315_s3 = scalar_lea.sflag [#allocation4], %s314_s16 }
  0x28   : > { %p1282_p1 = pneg %p1672_p10 }
  0x2b   : > { %s1664_s2 = scalar_lea.hbm %s1994_s4, %s1094_s10  ;;  %s1285_s19 = scalar_lea.hbm %s1994_s4, 6400 }
  0x2c   : > { %s1280_s5 = scalar_lea.hbm %s1664_s2, 64  ;;  %p1286_p3 = scmp.lt.u32.totalorder %s1664_s2, %s1994_s4 }
  0x2d   : > { %p1281_p13 = scmp.ne.s32.totalorder %s1664_s2, %s1280_s5  ;;  %p1287_p9 = scmp.lt.u32.totalorder %s1285_s19, %s1280_s5 }
  0x2e   : > { %p1289_p11 = scmp.lt.u32.totalorder %s1280_s5, %s1664_s2 }
  0x2f   : > { %p1283_p4 = pnand %p1282_p1, %p1281_p13  ;;  %p1288_p2 = por %p1287_p9, %p1286_p3 }
  0x31   : > { %p1284_p6 = pneg %p1283_p4  ;;  %p1290_p12 = por %p1289_p11, %p1288_p2 }
  0x33   : > { %p1291_p8 = pnand %p1290_p12, %p1284_p6 }
  0x35   : > { %1294 = shalt.err (!%p1291_p8)
}
  0x36   : > { %s1295_s16 = scalar_lea.vmem %s1666_s1, 64  ;;  %s1492_s7 = smov [#allocation3]  }
  0x37   : > { %p1296_p13 = scmp.ne.s32.totalorder %s1666_s1, %s1295_s16  ;;  %s1300_s10 = sshll.u32 %s1492_s7, 4  ;;  %s1301_s10 = int_to_ptr.vmem [resolvable:$false] %s1300_s10 }
  0x38   : > { %s1302_s30 = scalar_lea.vmem %s1301_s10, 128  ;;  %p1303_p5 = scmp.lt.s32.totalorder %s1666_s1, %s1301_s10 }
  0x39   : > { %p1298_p4 = pnand %p1296_p13, %p1282_p1  ;;  %p1304_p9 = scmp.lt.s32.totalorder %s1302_s30, %s1295_s16 }
  0x3b   : > { %p1299_p7 = pneg %p1298_p4  ;;  %p1305_p3 = por %p1304_p9, %p1303_p5 }
  0x3d   : > { %p1306_p2 = pnand %p1305_p3, %p1299_p7 }
  0x3f   : > { %1309 = shalt.err (!%p1306_p2)
}
  0x40   : > { %1137 = dma.hbm_to_vmem [thread:$0]  (!%p1672_p10), %s1664_s2, 64, %s1666_s1, %s315_s3  }
  0x41   : > { %p1996_p5 = scmp.lt.s32.totalorder %s1490_s14, 201  ;;  %p1997_p7 = scmp.ge.s32.totalorder %s1490_s14, 1 }
  0x42   : > { %s1090_s5 = sadd.s32 4294967294, %s1490_s14   ;;  %s45_s19 = sadd.s32 1, %s1486_s13 }
  0x43   : > { %p1707_p8 = pnand %p1997_p7, %p1996_p5  ;;  %s2045_s19 = smov (!%p1617_p0, %s45_s19), %s1486_s13 }
  0x44   : > { %s213_s15 = sadd.s32 1, %s1458_s29  ;;  %p220_p11 = scmp.ne.s32.totalorder %s1458_s29, %s1454_s28 }
  0x45   : > { %p47_p12 = scmp.ge.s32.totalorder %s2045_s19, 2  ;;  %p226_p1 = scmp.ne.s32.totalorder %s1454_s28, %s1450_s27 }
  0x46   : > { %p1999_p10 = scmp.eq.s32.totalorder %s1490_s14, 0  ;;  %s241_s2 = sadd.s32 1, %s1446_s26 }
  0x47   : > { %s2047_s19 = smov (%p47_p12, %s2045_s19), 0  ;;  %p2002_p13 = scmp.ne.s32.totalorder %s1990_s21, 0 }
  0x48   : > { %p1723_p6 = por %p220_p11, %p1999_p10  ;;  %2001 = sst [smem:[#allocation20_spill]] %s2047_s19 }
  0x49   : > { %p1732_p0 = por %p226_p1, %p2002_p13  ;;  %p251_p4 = scmp.ne.s32.totalorder %s1446_s26, %s1442_s25 }
  0x4a   : > { %s207_s3 = ssub.s32 %s1486_s13, %s2047_s19  ;;  %p257_p9 = scmp.ne.s32.totalorder %s1442_s25, %s1438_s24 }
  0x4b   : > { %s2003_s17 = scalar_select %p1732_p0, 1, 0 }
  0x4c   : > { %s208_s27 = sor.u32 %s207_s3, %s1638_s20  ;;  %p239_p3 = scmp.eq.s32.totalorder %s207_s3, 0 }
  0x4d   : > { %p211_p2 = scmp.eq.s32.totalorder %s208_s27, 0  ;;  %p2004_p5 = scmp.ne.s32.totalorder %s1991_s22, 0 }
  0x4e   : > { %s1750_s21 = scalar_select %p239_p3, %s1446_s26, %s241_s2  }
  0x4f   : > { %p1745_p7 = por %p2004_p5, %p251_p4  ;;  %p258_p11 = scmp.eq.s32.totalorder %s1090_s5, 199 }
  0x50   : > { %s1753_s7 = scalar_select %p211_p2, %s1458_s29, %s213_s15  }
  0x51   : > { %s2005_s16 = scalar_select %p1745_p7, 1, 0 }
  0x52   : > { %2006 = sst [smem:[#allocation21_spill]] %s1753_s7  ;;  %s345_s10 = sand.u32 1, %s1458_s29  }
  0x53   : > { %s1095_s30 = sshll.u32 %s345_s10, 3  ;;  %p1756_p12 = por %p258_p11, %p257_p9 }
  0x54   : > { %s1096_s20 = sshll.u32 %s1486_s13, 1  ;;  %s1097_s3 = sshll.u32 %s1482_s12, 2 }
  0x55   : > { %s2007_s4 = scalar_select %p1756_p12, 1, 0 }
  0x56   : > { %s357_s22 = sadd.s32 %s1097_s3, %s1096_s20  ;;  %s349_s27 = scalar_lea.vmem [#allocation6], %s1095_s30 }
  0x57   : > { %s361_s19 = sshll.u32 %s349_s27, 4  ;;  %s1098_s9 = sshll.u32 %s357_s22, 6  ;;  %s1762_s19 = int_to_ptr.vmem [resolvable:$true] %s361_s19 }
  0x58   : > { %s2008_s6 = sld [smem:[#allocation27_spill]]  ;;  %p2009_p1 = scmp.lt.s32.totalorder %s1490_s14, 200 }
  0x59   : > { %s346_s30 = scalar_lea.sflag [#allocation7], %s345_s10 }
  0x5a   : > { %p1773_p10 = pnand %p2009_p1, %p1723_p6 }
  0x5c   : > { %p1312_p4 = pneg %p1773_p10 }
  0x5e   : > { %s1767_s15 = scalar_lea.hbm %s2008_s6, %s1098_s9  ;;  %s1315_s1 = scalar_lea.hbm %s2008_s6, 25600 }
  0x5f   : > { %s1310_s20 = scalar_lea.hbm %s1767_s15, 128  ;;  %p1316_p6 = scmp.lt.u32.totalorder %s1767_s15, %s2008_s6 }
  0x60   : > { %p1311_p13 = scmp.ne.s32.totalorder %s1767_s15, %s1310_s20  ;;  %p1317_p2 = scmp.lt.u32.totalorder %s1315_s1, %s1310_s20 }
  0x61   : > { %p1319_p11 = scmp.lt.u32.totalorder %s1310_s20, %s1767_s15 }
  0x62   : > { %p1313_p9 = pnand %p1312_p4, %p1311_p13  ;;  %p1318_p5 = por %p1317_p2, %p1316_p6 }
  0x64   : > { %p1314_p3 = pneg %p1313_p9  ;;  %p1320_p1 = por %p1319_p11, %p1318_p5 }
  0x66   : > { %p1321_p12 = pnand %p1320_p1, %p1314_p3 }
  0x68   : > { %1324 = shalt.err (!%p1321_p12)
}
  0x69   : > { %s1325_s10 = scalar_lea.vmem %s1762_s19, 128  ;;  %s1493_s27 = smov [#allocation6]  }
  0x6a   : > { %p1326_p13 = scmp.ne.s32.totalorder %s1762_s19, %s1325_s10  ;;  %s1330_s2 = sshll.u32 %s1493_s27, 4  ;;  %s1331_s2 = int_to_ptr.vmem [resolvable:$false] %s1330_s2 }
  0x6b   : > { %s1332_s24 = scalar_lea.vmem %s1331_s2, 256  ;;  %p1333_p0 = scmp.lt.s32.totalorder %s1762_s19, %s1331_s2 }
  0x6c   : > { %p1328_p9 = pnand %p1326_p13, %p1312_p4  ;;  %p1334_p6 = scmp.lt.s32.totalorder %s1332_s24, %s1325_s10 }
  0x6e   : > { %p1329_p7 = pneg %p1328_p9  ;;  %p1335_p2 = por %p1334_p6, %p1333_p0 }
  0x70   : > { %p1336_p5 = pnand %p1335_p2, %p1329_p7 }
  0x72   : > { %1339 = shalt.err (!%p1336_p5)
}
  0x73   : > { %1140 = dma.hbm_to_vmem [thread:$0]  (!%p1773_p10), %s1767_s15, 128, %s1762_s19, %s346_s30  }
  0x74   : > { %370 = sbr.rel (%p1707_p8) target bundleno = 501 (0x1f5), region = 48  ;;  %s372_s20 = sand.u32 (!%p1707_p8), 1, %s1466_s8  }
  0x75   : > { %s1100_s9 = sshll.u32 (!%p1707_p8), %s372_s20, 2  ;;  %s373_s1 = scalar_lea.sflag (!%p1707_p8), [#allocation4], %s372_s20 }
  0x76   : > { %s376_s3 = scalar_lea.vmem (!%p1707_p8), [#allocation3], %s1100_s9  ;;  %p2011_p12 = scmp.ne.s32.totalorder (!%p1707_p8), %s1992_s23, 0 }
  0x7b   : > { %1425 = dma.done.wait (%p2011_p12), %s373_s1, 64  }
  0x7c   : > { %1427 = vsyncadd (%p2011_p12), %s373_s1, 4294967232  ;;  %s381_s5 = sand.u32 1, %s1454_s28   ;;  %p2012_p8 = scmp.ne.s32.totalorder %s2003_s17, 0 }
  0x7d   : > { %s1810_s22 = sshll.u32 %s381_s5, 3  ;;  %s382_s19 = scalar_lea.sflag [#allocation7], %s381_s5 }
  0x7e   : > { %1429 = dma.done.wait (%p2012_p8), %s382_s19, 128  }
  0x7f   : > { %1431 = vsyncadd (%p2012_p8), %s382_s19, 4294967168  ;;  %s1970_s15 = sand.u32 1, %s1442_s25   ;;  %p453_p0 = scmp.lt.s32.totalorder %s1478_s11, 1  ;;  %v1840_v2 = vld [vmem:[%s376_s3] sm:$0xf] }
  0x80   : > { %s1102_s23 = sshll.u32 %s1970_s15, 3  ;;  %s2013_s1 = sld [smem:[#allocation22_spill]] }
  0x81   : > { %s454_s30 = scalar_select %p453_p0, %s1478_s11, 1 }
  0x82   : > { %s2014_s6 = sld [smem:[#allocation23_spill]]  ;;  %s2015_s8 = sld [smem:[#allocation24_spill]] }
  0x83   : > { %s1822_s10 = sshll.u32 %s454_s30, 3  ;;  %s1107_s27 = sshll.u32 %s454_s30, 2 }
  0x84   : > { %s2016_s7 = sld [smem:[#allocation26_spill]]  ;;  %s1849_s9 = scalar_lea.vmem [#allocation8], %s1102_s23 }
  0x86   : > { %s470_s5 = scalar_lea.vmem %s2013_s1, %s1822_s10  ;;  %s2017_s1 = sld [smem:[#allocation15_spill]] }
  0x88   : > { %v488_v0 = vld [vmem:[%s2014_s6] sm:$0xff]  ;;  %v1838_v1 = vld [vmem:[%s2014_s6 + $0x8] sm:$0xf]  ;;  %s475_s2 = scalar_lea.vmem %s2015_s8, %s1107_s27 }
  0x8a   : > { %s484_s20 = scalar_lea.vmem %s2016_s7, %s1822_s10 }
  0x8c   : > { %p1110_p7 = scmp.ne.s32.totalorder %s2017_s1, 0 }
  0x8d   : > { %v1494_v3 = vmov (!%p1110_p7), 0   ;;  %v1495_v4 = vmov (!%p1110_p7), 1   ;;  %v497_v5 = vld [vmem:[%s475_s2] sm:$0xf] (!%p1110_p7)  ;;  %v1496_v6 = vmov (!%p1110_p7), 2   ;;  %v1497_v7 = vmov (!%p1110_p7), 3   ;;  %s2018_s13 = scalar_lea.vmem (!%p1110_p7), %s1950_s0, %s1822_s10 }
  0x8e   : > { %494 = sbr.rel (%p1110_p7) target bundleno = 294 (0x126), region = 60  ;;  %1271 = vset.pattern.permute.xlu0 (!%p1110_p7), %v1494_v3  ;;  %1272 = vset.pattern.permute.xlu1 (!%p1110_p7), %v1495_v4  ;;  %v727_v8 = vld [vmem:[%s484_s20] sm:$0xff] (!%p1110_p7)  ;;  %v509_v9 = vlaneseq (!%p1110_p7) }
  0x8f   : > { %505 = vperm.xlu0 (!%p1110_p7), %1271, %v488_v0   ;;  %561 = vperm.xlu1 (!%p1110_p7), %1272, %v488_v0   ;;  %728 = vst [vmem:[%s1849_s9] sm:$0xff] (!%p1110_p7), %v727_v8  ;;  %v496_v13 = vld [vmem:[%s470_s5] sm:$0xff] (!%p1110_p7) }
  0x90   : > { %v510_v10 = vshrl.u32 (!%p1110_p7), %v509_v9, 7  ;;  %v495_v16 = vld [vmem:[%s2018_s13] sm:$0xff] (!%p1110_p7) }
  0x92   : > { %v511_v11 = vsub.s32 (!%p1110_p7), 0, %v510_v10  ;;  %v515_v12 = vsub.s32 (!%p1110_p7), 4, %v510_v10  ;;  %v566_v14 = vsub.s32 (!%p1110_p7), 1, %v510_v10  ;;  %v570_v15 = vsub.s32 (!%p1110_p7), 5, %v510_v10 }
  0x93   : > { %500 = vperm.xlu0 (!%p1110_p7), %1271, %v497_v5   ;;  %1273 = vset.pattern.permute.xlu1 (!%p1110_p7), %v1496_v6  ;;  %v620_v19 = vsub.s32 (!%p1110_p7), 2, %v510_v10  ;;  %v624_v20 = vsub.s32 (!%p1110_p7), 6, %v510_v10  ;;  %v674_v33 = vsub.s32 (!%p1110_p7), 3, %v510_v10  ;;  %v678_v34 = vsub.s32 (!%p1110_p7), 7, %v510_v10 }
  0x94   : > { %615 = vperm.xlu1 (!%p1110_p7), %1273, %v488_v0   ;;  %v535_v17 = vrot.slane (!%p1110_p7), %v496_v13, %v511_v11  ;;  %v539_v18 = vrot.slane (!%p1110_p7), %v496_v13, %v515_v12  ;;  %v512_v21 = vrot.slane (!%p1110_p7), %v495_v16, %v511_v11  ;;  %v516_v22 = vrot.slane (!%p1110_p7), %v495_v16, %v515_v12 }
  0x95   : > { %v589_v23 = vrot.slane %v496_v13, %v566_v14  ;;  %v593_v24 = vrot.slane %v496_v13, %v570_v15  ;;  %v567_v25 = vrot.slane %v495_v16, %v566_v14  ;;  %v571_v26 = vrot.slane %v495_v16, %v570_v15 }
  0x96   : > { %v545_v27 = vrot.slane %v535_v17, %v511_v11  ;;  %v549_v28 = vrot.slane %v539_v18, %v511_v11  ;;  %v621_v29 = vrot.slane %v495_v16, %v620_v19  ;;  %v625_v30 = vrot.slane %v495_v16, %v624_v20 }
  0x97   : > { %1274 = vset.pattern.permute.xlu0 %v1497_v7  ;;  %v643_v31 = vrot.slane %v496_v13, %v620_v19  ;;  %v647_v32 = vrot.slane %v496_v13, %v624_v20  ;;  %v522_v35 = vrot.slane %v512_v21, %v511_v11  ;;  %v526_v36 = vrot.slane %v516_v22, %v511_v11 }
  0x98   : > { %669 = vperm.xlu0 %1274, %v488_v0   ;;  %v599_v37 = vrot.slane %v589_v23, %v566_v14  ;;  %v603_v38 = vrot.slane %v593_v24, %v566_v14  ;;  %v577_v41 = vrot.slane %v567_v25, %v566_v14  ;;  %v581_v42 = vrot.slane %v571_v26, %v566_v14 }
  0x99   : > { %v631_v45 = vrot.slane %v621_v29, %v620_v19  ;;  %v635_v46 = vrot.slane %v625_v30, %v620_v19  ;;  %v653_v47 = vrot.slane %v643_v31, %v620_v19  ;;  %v657_v48 = vrot.slane %v647_v32, %v620_v19 }
  0x9a   : > { %v697_v49 = vrot.slane %v496_v13, %v674_v33  ;;  %v701_v50 = vrot.slane %v496_v13, %v678_v34  ;;  %v675_v58 = vrot.slane %v495_v16, %v674_v33  ;;  %v679_v59 = vrot.slane %v495_v16, %v678_v34 }
  0x9c   : > { %v707_v5 = vrot.slane %v697_v49, %v674_v33  ;;  %v711_v6 = vrot.slane %v701_v50, %v674_v33  ;;  %v685_v11 = vrot.slane %v675_v58, %v674_v33  ;;  %v689_v12 = vrot.slane %v679_v59, %v674_v33 }
 0x10e   : > { %v506_v39 = vpop.permute.xlu0 %505  ;;  %v562_v40 = vpop.permute.xlu1 %561 }
 0x10f   : > { %v550_v43 = vmul.f32 %v545_v27, %v506_v39  ;;  %v551_v44 = vmul.f32 %v549_v28, %v506_v39  ;;  %v527_v51 = vmul.f32 %v522_v35, %v506_v39  ;;  %v528_v52 = vmul.f32 %v526_v36, %v506_v39 }
 0x110   : > { %v604_v53 = vmul.f32 %v599_v37, %v562_v40  ;;  %v605_v54 = vmul.f32 %v603_v38, %v562_v40  ;;  %v582_v56 = vmul.f32 %v577_v41, %v562_v40  ;;  %v583_v57 = vmul.f32 %v581_v42, %v562_v40 }
 0x111   : > { %v554_v62 = vrot.slane %v550_v43, 4  ;;  %v555_v63 = vrot.slane %v551_v44, 4 }
 0x112   : > { %v501_v55 = vpop.permute.xlu0 %500  ;;  %v608_v9 = vrot.slane %v604_v53, 4  ;;  %v609_v10 = vrot.slane %v605_v54, 4 }
 0x113   : > { %v529_v60 = vadd.f32 %v527_v51, %v501_v55  ;;  %v530_v61 = vadd.f32 %v528_v52, %v501_v55  ;;  %v616_v0 = vpop.permute.xlu1 %615 }
 0x114   : > { %v658_v3 = vmul.f32 %v653_v47, %v616_v0  ;;  %v659_v4 = vmul.f32 %v657_v48, %v616_v0  ;;  %v636_v15 = vmul.f32 %v631_v45, %v616_v0  ;;  %v637_v17 = vmul.f32 %v635_v46, %v616_v0 }
 0x115   : > { %v558_v7 = vadd.f32 %v554_v62, %v529_v60  ;;  %v559_v8 = vadd.f32 %v555_v63, %v530_v61 }
 0x116   : > { %v662_v18 = vrot.slane %v658_v3, 4  ;;  %v663_v19 = vrot.slane %v659_v4, 4 }
 0x117   : > { %v584_v13 = vadd.f32 %v582_v56, %v558_v7  ;;  %v585_v14 = vadd.f32 %v583_v57, %v559_v8  ;;  %v670_v16 = vpop.permute.xlu0 %669 }
 0x118   : > { %v712_v22 = vmul.f32 %v707_v5, %v670_v16  ;;  %v713_v23 = vmul.f32 %v711_v6, %v670_v16  ;;  %v690_v26 = vmul.f32 %v685_v11, %v670_v16  ;;  %v691_v27 = vmul.f32 %v689_v12, %v670_v16 }
 0x119   : > { %v612_v20 = vadd.f32 %v608_v9, %v584_v13  ;;  %v613_v21 = vadd.f32 %v609_v10, %v585_v14 }
 0x11a   : > { %v716_v30 = vrot.slane %v712_v22, 4  ;;  %v717_v31 = vrot.slane %v713_v23, 4 }
 0x11b   : > { %v638_v24 = vadd.f32 %v636_v15, %v612_v20  ;;  %v639_v25 = vadd.f32 %v637_v17, %v613_v21 }
 0x11d   : > { %v666_v28 = vadd.f32 %v662_v18, %v638_v24  ;;  %v667_v29 = vadd.f32 %v663_v19, %v639_v25 }
 0x11f   : > { %v692_v32 = vadd.f32 %v690_v26, %v666_v28  ;;  %v693_v33 = vadd.f32 %v691_v27, %v667_v29 }
 0x121   : > { %v720_v34 = vadd.f32 %v716_v30, %v692_v32  ;;  %v721_v35 = vadd.f32 %v717_v31, %v693_v33 }
 0x123   : > { %v724_v36 = vcombine.low %v720_v34, %v721_v35 }
 0x125   : > { %726 = vst [vmem:[#allocation2] sm:$0xff] %v724_v36 }
 0x126 PF: > { %s1498_s7 = smov 127   ;;  %v1499_v37 = vmov 0   ;;  %s1500_s3 = smov 125   ;;  %v1502_v38 = vmov 1   ;;  %v1503_v39 = vmov 3   ;;  %v1504_v40 = vmov 2  }
 0x127   : > { %862 = vrot.lane.b32.xlu0 %v1840_v2, %s1498_s7  ;;  %1275 = vset.pattern.permute.xlu1 %v1499_v37  ;;  %s1501_s18 = smov 126   ;;  %v1505_v45 = vmov 839922192   ;;  %v729_v49 = vld [vmem:[%s1849_s9] sm:$0xff]  ;;  %s2019_s10 = scalar_lea.vmem [#allocation6], %s1810_s22 }
 0x128   : > { %876 = vrot.lane.b32.xlu1 %v1840_v2, %s1500_s3  ;;  %1276 = vset.pattern.permute.xlu0 %v1499_v37  ;;  %v736_v46 = vunpack.c.l.s4 %v1505_v45  ;;  %v875_v36 = vld [vmem:[%s2019_s10] sm:$0xff]  ;;  %s2020_s17 = sld [smem:[#allocation15_spill]] }
 0x12a   : > { %v737_v51 = vunpack.c.0.s8 %v736_v46 }
 0x12b   : > { %868 = vrot.lane.b32.xlu0 %v1840_v2, %s1501_s18 }
 0x12c   : > { %733 = vperm.xlu1 %1275, %v1840_v2   ;;  %v738_v2 = vlaneseq  ;;  %v730_v11 = vld [vmem:[#allocation2] sm:$0xff] }
 0x12e   : > { %v739_v44 = vshrl.u32 %v738_v2, 7  ;;  %p1111_p10 = scmp.ne.s32.totalorder %s2020_s17, 99 }
 0x12f   : > { %746 = vperm.xlu0 %1276, %v1838_v1  }
 0x130   : > { %1277 = vset.pattern.permute.xlu1 %v1502_v38  ;;  %v752_v47 = vsub.s32 0, %v739_v44  ;;  %v756_v48 = vsub.s32 4, %v739_v44  ;;  %v781_v50 = vsub.s32 1, %v739_v44  ;;  %v785_v54 = vsub.s32 5, %v739_v44 }
 0x131   : > { %776 = vperm.xlu1 %1277, %v1838_v1   ;;  %v810_v56 = vsub.s32 2, %v739_v44  ;;  %v814_v57 = vsub.s32 6, %v739_v44  ;;  %v740_v58 = vsub.s32 %v737_v51, %v739_v44  ;;  %v839_v5 = vsub.s32 3, %v739_v44 }
 0x132   : > { %v753_v52 = vrot.slane %v729_v49, %v752_v47  ;;  %v757_v53 = vrot.slane %v729_v49, %v756_v48  ;;  %v786_v61 = vrot.slane %v729_v49, %v785_v54  ;;  %v843_v6 = vsub.s32 7, %v739_v44 }
 0x133   : > { %1279 = vset.pattern.permute.xlu0 %v1503_v39  ;;  %v811_v3 = vrot.slane %v729_v49, %v810_v56  ;;  %v815_v4 = vrot.slane %v729_v49, %v814_v57  ;;  %v840_v14 = vrot.slane %v729_v49, %v839_v5 }
 0x134   : > { %834 = vperm.xlu0 %1279, %v1838_v1   ;;  %v763_v59 = vrot.slane %v753_v52, %v752_v47  ;;  %v767_v60 = vrot.slane %v757_v53, %v752_v47  ;;  %v796_v10 = vrot.slane %v786_v61, %v781_v50  ;;  %v844_v15 = vrot.slane %v729_v49, %v843_v6 }
 0x135   : > { %1278 = vset.pattern.permute.xlu1 %v1504_v40  ;;  %v821_v12 = vrot.slane %v811_v3, %v810_v56  ;;  %v825_v13 = vrot.slane %v815_v4, %v810_v56  ;;  %v850_v21 = vrot.slane %v840_v14, %v839_v5 }
 0x136   : > { %805 = vperm.xlu1 %1278, %v1838_v1   ;;  %v782_v1 = vrot.slane %v729_v49, %v781_v50  ;;  %v854_v22 = vrot.slane %v844_v15, %v839_v5 }
 0x138   : > { %v792_v63 = vrot.slane %v782_v1, %v781_v50 }
 0x199   : > { %v863_v41 = vpop.permute.xlu0 %862 }
 0x19a   : > { %1122 = vpush %v863_v41  ;;  %v877_v42 = vpop.permute.xlu1 %876 }
 0x19d   : > { %v869_v43 = vpop.permute.xlu0 %868 }
 0x19e   : > { %1124 = vpush %v869_v43 }
 0x19f   : > { %1126 = vpush %v877_v42 }
 0x1ab   : > { %v734_v55 = vpop.permute.xlu1 %733 }
 0x1ac   : > { %v741_v7 = vrot.slane %v734_v55, %v740_v58 }
 0x1ae   : > { %v747_v62 = vpop.permute.xlu0 %746  ;;  %v743_v17 = vadd.f32 %v741_v7, %v730_v11 }
 0x1af   : > { %v768_v8 = vmul.f32 %v763_v59, %v747_v62  ;;  %v769_v9 = vmul.f32 %v767_v60, %v747_v62 }
 0x1b0   : > { %v777_v0 = vpop.permute.xlu1 %776 }
 0x1b1   : > { %v772_v16 = vcombine.low %v768_v8, %v769_v9  ;;  %v797_v18 = vmul.f32 %v792_v63, %v777_v0  ;;  %v798_v19 = vmul.f32 %v796_v10, %v777_v0 }
 0x1b3   : > { %v774_v23 = vadd.f32 %v772_v16, %v743_v17  ;;  %v801_v24 = vcombine.low %v797_v18, %v798_v19  ;;  %v835_v27 = vpop.permute.xlu0 %834 }
 0x1b4   : > { %v855_v30 = vmul.f32 %v850_v21, %v835_v27  ;;  %v856_v31 = vmul.f32 %v854_v22, %v835_v27 }
 0x1b5   : > { %v806_v20 = vpop.permute.xlu1 %805  ;;  %v803_v28 = vadd.f32 %v801_v24, %v774_v23 }
 0x1b6   : > { %v826_v25 = vmul.f32 %v821_v12, %v806_v20  ;;  %v827_v26 = vmul.f32 %v825_v13, %v806_v20  ;;  %v859_v33 = vcombine.low %v855_v30, %v856_v31 }
 0x1b8   : > { %v830_v29 = vcombine.low %v826_v25, %v827_v26 }
 0x1ba   : > { %v832_v32 = vadd.f32 %v830_v29, %v803_v28 }
 0x1bc   : > { %v861_v35 = vadd.f32 %v859_v33, %v832_v32 }
 0x1cb   : > { %s1123_s15 = spop %1122 }
 0x1cc   : > { %v865_v34 = vstv %s1123_s15 }
 0x1cd   : > { %v867_v38 = vmul.f32 %v865_v34, %v729_v49 }
 0x1cf   : > { %s1125_s23 = spop %1124 }
 0x1d0   : > { %v871_v37 = vstv %s1125_s23  ;;  %s1127_s27 = spop %1126 }
 0x1d1   : > { %v873_v39 = vmul.f32 %v871_v37, %v861_v35  ;;  %v879_v40 = vstv %s1127_s27  ;;  %887 = sbr.rel (%p1111_p10) target bundleno = 474 (0x1da), region = 64 }
 0x1d2   : > { %v881_v41 = vmul.f32 %v879_v40, %v875_v36 }
 0x1d3   : > { %v874_v42 = vsub.f32 %v867_v38, %v873_v39 }
 0x1d5   : > { %v882_v43 = vadd.f32 %v881_v41, %v874_v42 }
 0x1d7   : > { %883 = vst [vmem:[%s1849_s9] sm:$0xff] %v882_v43  ;;  %v1112_v2 = vclamps-f32 (!%p1111_p10), %v882_v43, 1.0 }
 0x1d9   : > { %890 = vst [vmem:[%s1849_s9] sm:$0xff] %v1112_v2 }
 0x1da PF: > { %s1121_s22 = sshll.u32 %s1478_s11, 7  ;;  %s2021_s30 = sld [smem:[#allocation28_spill]] }
 0x1db   : > { %s908_s20 = sshll.u32 %s1849_s9, 4  ;;  %s2023_s1 = sand.u32 1, %s1442_s25   ;;  %s909_s20 = int_to_ptr.vmem [resolvable:$true] %s908_s20 }
 0x1dc   : > { %s892_s8 = scalar_lea.sflag [#allocation5], %s2023_s1  ;;  %s1340_s12 = scalar_lea.vmem %s909_s20, 128 }
 0x1dd   : > { %p1341_p4 = scmp.ne.s32.totalorder %s909_s20, %s1340_s12  ;;  %p2024_p3 = scmp.ne.s32.totalorder %s2005_s16, 0 }
 0x1de   : > { %s1506_s13 = smov [#allocation8]  }
 0x1df   : > { %p1342_p11 = pnand %p1341_p4, %p2024_p3  ;;  %s1344_s7 = sshll.u32 %s1506_s13, 4  ;;  %s1345_s7 = int_to_ptr.vmem [resolvable:$false] %s1344_s7 }
 0x1e0   : > { %s2022_s2 = smov %s2021_s30  ;;  %s1876_s24 = scalar_lea.hbm %s2021_s30, %s1121_s22 }
 0x1e1   : > { %p1343_p1 = pneg %p1342_p11  ;;  %s1346_s3 = scalar_lea.vmem %s1345_s7, 256 }
 0x1e2   : > { %p1347_p13 = scmp.lt.s32.totalorder %s909_s20, %s1345_s7  ;;  %p1348_p9 = scmp.lt.s32.totalorder %s1346_s3, %s1340_s12 }
 0x1e4   : > { %p1349_p6 = por %p1348_p9, %p1347_p13 }
 0x1e6   : > { %p1350_p2 = pnand %p1349_p6, %p1343_p1 }
 0x1e8   : > { %1353 = shalt.err (!%p1350_p2)
}
 0x1e9   : > { %s1354_s11 = scalar_lea.hbm %s1876_s24, 128  ;;  %s1358_s15 = scalar_lea.hbm %s2022_s2, 256 }
 0x1ea   : > { %p1355_p5 = scmp.ne.s32.totalorder %s1876_s24, %s1354_s11  ;;  %p1359_p0 = scmp.lt.u32.totalorder %s1876_s24, %s2022_s2 }
 0x1eb   : > { %p1360_p7 = scmp.lt.u32.totalorder %s1358_s15, %s1354_s11  ;;  %p1362_p4 = scmp.lt.u32.totalorder %s1354_s11, %s1876_s24 }
 0x1ec   : > { %p1356_p12 = pnand %p1355_p5, %p2024_p3 }
 0x1ed   : > { %p1361_p10 = por %p1360_p7, %p1359_p0 }
 0x1ee   : > { %p1357_p8 = pneg %p1356_p12 }
 0x1ef   : > { %p1363_p11 = por %p1362_p4, %p1361_p10 }
 0x1f1   : > { %p1364_p1 = pnand %p1363_p11, %p1357_p8 }
 0x1f3   : > { %1367 = shalt.err (!%p1364_p1)
}
 0x1f4   : > { %1132 = dma.vmem_to_hbm [thread:$0]  (%p2024_p3), %s909_s20, 128, %s1876_s24, %s892_s8  }
 0x1f5 PF: > { %s2025_s27 = sld [smem:[#allocation12_spill]]  ;;  %p1146_p13 = scmp.ge.s32.totalorder %s1490_s14, 2 }
 0x1f6   : > { %p2026_p9 = scmp.ne.s32.totalorder %s2007_s4, 0 }
 0x1f8   : > { %p1142_p6 = pnand %p1146_p13, %p2026_p9 }
 0x1fb   : > { %s920_s17 = sand.u32 1, %s2025_s27  }
 0x1fc   : > { %s921_s22 = scalar_lea.sflag [#allocation5], %s920_s17 }
 0x1fd   : > { %1433 = dma.done.wait (!%p1142_p6), %s921_s22, 128  }
 0x1fe   : > { %1435 = vsyncadd (!%p1142_p6), %s921_s22, 4294967168  ;;  %s26_s14 = sadd.s32 1, %s1490_s14   ;;  %s2028_s16 = sld [smem:[#allocation21_spill]] }
 0x1ff   : > { %p1903_p2 = scmp.ge.s32.totalorder %s26_s14, 202   ;;  %s2029_s30 = sld [smem:[#allocation13_spill]] }
 0x200   : > { %s2030_s8 = sld [smem:[#allocation14_spill]]  ;;  %s2031_s9 = sld [smem:[#allocation19_spill]] }
 0x201   : > { %s2032_s10 = sld [smem:[#allocation16_spill]]  ;;  %s2033_s11 = sld [smem:[#allocation17_spill]] }
 0x202   : > { %s2034_s12 = sld [smem:[#allocation18_spill]]  ;;  %s2035_s13 = sld [smem:[#allocation20_spill]] }
 0x203   : > { %s2036_s24 = smov %s1442_s25  ;;  %s2037_s25 = smov %s1446_s26 }
 0x204   : > { %s2038_s26 = smov %s1750_s21  ;;  %s2039_s27 = smov %s1454_s28 }
 0x205   : > { %s2040_s28 = smov %s1458_s29  ;;  %s2041_s29 = smov %s2028_s16 }
 0x206   :  { %25 = sbr.rel (!%p1903_p2) target bundleno = 20 (0x14), region = 126 }
 0x20d   :  { %926 = vsyncpa [#allocation4], 1 }
 0x20e   :  { %928 = vsyncpa [#allocation4 + $0x1], 1 }
 0x20f   :  { %929 = vsyncpa [#allocation7], 1 }
 0x210   :  { %931 = vsyncpa [#allocation7 + $0x1], 1 }
 0x211   :  { %932 = vsyncpa [#allocation5], 1 }
 0x212   :  { %934 = vsyncpa [#allocation5 + $0x1], 1 }

</bundles_post_ra>
